<compile_context>
chip_gen: v5e
topology: v5e:2x2
jax: 0.10.0
libtpu: 0.0.40
codegen_flags: <defaults>
</compile_context>

<pallas_src>
import jax
import jax.numpy as jnp
from jax.experimental import pallas as pl
from jax.experimental.pallas import tpu as pltpu  # noqa: F401  (TPU backend)


# ---------------------------------------------------------------------------
# Pallas kernel:
#   x = onehot(step) @ table            (fused gather, exact: weights are 0/1)
#   h = silu(x @ w1 + b1)               (bf16 MXU operands, f32 accumulate)
#   y = silu(h @ w2 + b2)
# ---------------------------------------------------------------------------
def _diffusion_embedding_kernel(step_ref, emb_ref, w1_ref, b1_ref, w2_ref,
                                b2_ref, o_ref):
    B = step_ref.shape[0]
    T = emb_ref.shape[0]

    # Fused gather via one-hot matmul (exact row selection, f32).
    t_ids = jax.lax.broadcasted_iota(jnp.int32, (B, T), 1)          # (B, T)
    onehot = (t_ids == step_ref[...]).astype(jnp.float32)           # (B, T)
    x = jnp.dot(onehot, emb_ref[...],
                preferred_element_type=jnp.float32)                 # (B, E) f32

    # Projection 1 + SiLU (elementwise in f32).
    h = jnp.dot(x.astype(w1_ref.dtype), w1_ref[...],
                preferred_element_type=jnp.float32)                 # (B, P) f32
    h = h + b1_ref[...]                                             # (1, P) bcast
    h = h * jax.nn.sigmoid(h)                                       # SiLU

    # Projection 2 + SiLU.
    y = jnp.dot(h.astype(w2_ref.dtype), w2_ref[...],
                preferred_element_type=jnp.float32)                 # (B, P) f32
    y = y + b2_ref[...]
    y = y * jax.nn.sigmoid(y)

    o_ref[...] = y.astype(o_ref.dtype)


def diffusion_embedding_forward(diffusion_step, embedding, w1, b1, w2, b2):
    """diffusion_step: int (B,); embedding: (T, E); w*: (in, out); b*: (1, P)."""
    B = diffusion_step.shape[0]
    T, E = embedding.shape
    P = w1.shape[1]

    # Pad rows up to a multiple of 8 (sublane size); padded rows gather row 0
    # and are sliced off afterwards.
    B_pad = ((B + 7) // 8) * 8
    steps = diffusion_step.astype(jnp.int32).reshape(B, 1)
    if B_pad != B:
        steps = jnp.pad(steps, ((0, B_pad - B), (0, 0)))

    out = pl.pallas_call(
        _diffusion_embedding_kernel,
        out_shape=jax.ShapeDtypeStruct((B_pad, P), jnp.float32),
        in_specs=[
            pl.BlockSpec((B_pad, 1), lambda: (0, 0)),   # step ids
            pl.BlockSpec((T, E), lambda: (0, 0)),       # embedding table
            pl.BlockSpec((E, P), lambda: (0, 0)),       # w1 (in, out)
            pl.BlockSpec((1, P), lambda: (0, 0)),       # b1
            pl.BlockSpec((P, P), lambda: (0, 0)),       # w2 (in, out)
            pl.BlockSpec((1, P), lambda: (0, 0)),       # b2
        ],
        out_specs=pl.BlockSpec((B_pad, P), lambda: (0, 0)),
    )(steps, embedding, w1, b1, w2, b2)

    return out[:B] if B_pad != B else out


# ---------------------------------------------------------------------------
# Parameter / buffer construction (matches the PyTorch __init__)
# ---------------------------------------------------------------------------
def build_embedding(num_steps, half_dim):
    """Replicates DiffusionEmbedding._build_embedding: (num_steps, 2*half_dim)."""
    steps = jnp.arange(num_steps, dtype=jnp.float32)[:, None]                      # (T, 1)
    freqs = 10.0 ** (jnp.arange(half_dim, dtype=jnp.float32) / (half_dim - 1) * 4.0)
    table = steps * freqs[None, :]                                                 # (T, half)
    return jnp.concatenate([jnp.sin(table), jnp.cos(table)], axis=1)               # (T, 2*half)


def init_params(key, embedding_dim, projection_dim):
    """f32 master weights in (in, out) layout; biases stored as (1, P)."""
    k1, k2, k3, k4 = jax.random.split(key, 4)
    scale1 = 1.0 / jnp.sqrt(embedding_dim)
    scale2 = 1.0 / jnp.sqrt(projection_dim)
    w1 = jax.random.uniform(k1, (embedding_dim, projection_dim), jnp.float32,
                            -scale1, scale1)
    b1 = jax.random.uniform(k2, (1, projection_dim), jnp.float32, -scale1, scale1)
    w2 = jax.random.uniform(k3, (projection_dim, projection_dim), jnp.float32,
                            -scale2, scale2)
    b2 = jax.random.uniform(k4, (1, projection_dim), jnp.float32, -scale2, scale2)
    return w1, b1, w2, b2


def reference_forward(diffusion_step, embedding, w1, b1, w2, b2):
    """Pure-JAX f32 reference of the PyTorch forward."""
    x = embedding[diffusion_step]
    x = x @ w1 + b1
    x = x * jax.nn.sigmoid(x)
    x = x @ w2 + b2
    x = x * jax.nn.sigmoid(x)
    return x


if __name__ == "__main__":
    num_steps = 50
    embedding_dim = 128
    projection_dim = 128
    batch = 8

    key = jax.random.PRNGKey(0)
    k_params, k_steps = jax.random.split(key)

    embedding = build_embedding(num_steps, embedding_dim // 2)        # (50, 128) f32
    w1_f32, b1, w2_f32, b2 = init_params(k_params, embedding_dim, projection_dim)

    # One-time pre-cast (hoisted out of the per-call path): bf16 weights take
    # the native MXU path on v6e/v7x and halve weight DMA bytes.
    w1 = w1_f32.astype(jnp.bfloat16)
    w2 = w2_f32.astype(jnp.bfloat16)

    diffusion_step = jax.random.randint(k_steps, (batch,), 0, num_steps,
                                        dtype=jnp.int32)

    fwd = jax.jit(diffusion_embedding_forward)
    out = jax.block_until_ready(fwd(diffusion_step, embedding, w1, b1, w2, b2))

    ref = reference_forward(diffusion_step, embedding, w1_f32, b1, w2_f32, b2)
    assert out.shape == (batch, projection_dim)
    # bf16 matmul operands (f32 accumulate) => relax tolerance vs pure-f32 ref.
    assert jnp.allclose(out, ref, atol=1e-2, rtol=1e-2), "mismatch vs reference"

    print("KERNEL_OK")
</pallas_src>

<mosaic_0001>
module attributes {stable_mosaic.version = 11 : i64} {
  func.func @_diffusion_embedding_kernel(%arg0: memref<8x1xi32, #tpu.memory_space<vmem>>, %arg1: memref<50x128xf32, #tpu.memory_space<vmem>>, %arg2: memref<128x128xbf16, #tpu.memory_space<vmem>>, %arg3: memref<1x128xf32, #tpu.memory_space<vmem>>, %arg4: memref<128x128xbf16, #tpu.memory_space<vmem>>, %arg5: memref<1x128xf32, #tpu.memory_space<vmem>>, %arg6: memref<8x128xf32, #tpu.memory_space<vmem>>) attributes {dimension_semantics = [], scalar_prefetch = 0 : i64, scratch_operands = 0 : i64, tpu.core_type = #tpu.core_type<tc>} {
    %0 = tpu.iota {dimensions = array<i32: 1>} : vector<8x50xi32>
    %c0 = arith.constant 0 : index
    %c0_0 = arith.constant 0 : index
    %1 = vector.load %arg0[%c0, %c0_0] : memref<8x1xi32, #tpu.memory_space<vmem>>, vector<8x1xi32>
    %2 = vector.broadcast %1 : vector<8x1xi32> to vector<8x50xi32>
    %3 = arith.cmpi eq, %0, %2 : vector<8x50xi32>
    %4 = arith.extui %3 : vector<8x50xi1> to vector<8x50xi32>
    %5 = arith.sitofp %4 : vector<8x50xi32> to vector<8x50xf32>
    %c0_1 = arith.constant 0 : index
    %c0_2 = arith.constant 0 : index
    %6 = vector.load %arg1[%c0_1, %c0_2] : memref<50x128xf32, #tpu.memory_space<vmem>>, vector<50x128xf32>
    %cst = arith.constant dense<0.000000e+00> : vector<8x128xf32>
    %7 = tpu.matmul %5, %6, %cst {dimension_numbers = #tpu.dot_dimension_numbers<[1], [0], [0], [1], [0, 0, 1, 1], [], []>} : vector<8x50xf32>, vector<50x128xf32>, vector<8x128xf32> -> vector<8x128xf32>
    %8 = arith.truncf %7 : vector<8x128xf32> to vector<8x128xbf16>
    %c0_3 = arith.constant 0 : index
    %c0_4 = arith.constant 0 : index
    %9 = vector.load %arg2[%c0_3, %c0_4] : memref<128x128xbf16, #tpu.memory_space<vmem>>, vector<128x128xbf16>
    %cst_5 = arith.constant dense<0.000000e+00> : vector<8x128xf32>
    %10 = tpu.matmul %8, %9, %cst_5 {dimension_numbers = #tpu.dot_dimension_numbers<[1], [0], [0], [1], [0, 0, 1, 1], [], []>} : vector<8x128xbf16>, vector<128x128xbf16>, vector<8x128xf32> -> vector<8x128xf32>
    %c0_6 = arith.constant 0 : index
    %c0_7 = arith.constant 0 : index
    %11 = vector.load %arg3[%c0_6, %c0_7] : memref<1x128xf32, #tpu.memory_space<vmem>>, vector<1x128xf32>
    %12 = vector.broadcast %11 : vector<1x128xf32> to vector<8x128xf32>
    %13 = arith.addf %10, %12 : vector<8x128xf32>
    %14 = arith.negf %13 : vector<8x128xf32>
    %15 = math.exp %14 : vector<8x128xf32>
    %cst_8 = arith.constant 1.000000e+00 : f32
    %16 = vector.broadcast %cst_8 : f32 to vector<8x128xf32>
    %17 = arith.addf %16, %15 : vector<8x128xf32>
    %18 = arith.divf %16, %17 : vector<8x128xf32>
    %19 = arith.mulf %13, %18 : vector<8x128xf32>
    %20 = arith.truncf %19 : vector<8x128xf32> to vector<8x128xbf16>
    %c0_9 = arith.constant 0 : index
    %c0_10 = arith.constant 0 : index
    %21 = vector.load %arg4[%c0_9, %c0_10] : memref<128x128xbf16, #tpu.memory_space<vmem>>, vector<128x128xbf16>
    %cst_11 = arith.constant dense<0.000000e+00> : vector<8x128xf32>
    %22 = tpu.matmul %20, %21, %cst_11 {dimension_numbers = #tpu.dot_dimension_numbers<[1], [0], [0], [1], [0, 0, 1, 1], [], []>} : vector<8x128xbf16>, vector<128x128xbf16>, vector<8x128xf32> -> vector<8x128xf32>
    %c0_12 = arith.constant 0 : index
    %c0_13 = arith.constant 0 : index
    %23 = vector.load %arg5[%c0_12, %c0_13] : memref<1x128xf32, #tpu.memory_space<vmem>>, vector<1x128xf32>
    %24 = vector.broadcast %23 : vector<1x128xf32> to vector<8x128xf32>
    %25 = arith.addf %22, %24 : vector<8x128xf32>
    %26 = arith.negf %25 : vector<8x128xf32>
    %27 = math.exp %26 : vector<8x128xf32>
    %cst_14 = arith.constant 1.000000e+00 : f32
    %28 = vector.broadcast %cst_14 : f32 to vector<8x128xf32>
    %29 = arith.addf %28, %27 : vector<8x128xf32>
    %30 = arith.divf %28, %29 : vector<8x128xf32>
    %31 = arith.mulf %25, %30 : vector<8x128xf32>
    %c0_15 = arith.constant 0 : index
    %c0_16 = arith.constant 0 : index
    %32 = vector.load %arg6[%c0_15, %c0_16] : memref<8x128xf32, #tpu.memory_space<vmem>>, vector<8x128xf32>
    tpu.vector_store %arg6[%c0_15, %c0_16], %31 {strides = array<i32>} : memref<8x128xf32, #tpu.memory_space<vmem>>, vector<8x128xf32>,
    return
  }
}

</mosaic_0001>

<bundles_post_ra>
// kernel: diffusion_embedding_forward.1
= control target key start
LH: loop header
LB: loop body
LE: loop exit
PB: predicated region body
PF: predicated region fallthrough
CT: control target
= control target key end

     0   :  { %11 = vsyncpa [#allocation3], 0  ;;  %s612_s0 = inlined_call_operand.vmem [shape: s32[8,1], index: 0, kind: input, shape index: {}]   ;;  %s613_s1 = inlined_call_operand.hbm [shape: f32[50,128], index: 1, kind: input, shape index: {}]   ;;  %s614_s2 = inlined_call_operand.hbm [shape: bf16[128,128], index: 2, kind: input, shape index: {}]   ;;  %s615_s3 = inlined_call_operand.vmem [shape: f32[1,128], index: 3, kind: input, shape index: {}]   ;;  %s616_s4 = inlined_call_operand.hbm [shape: bf16[128,128], index: 4, kind: input, shape index: {}]   ;;  %s617_s5 = inlined_call_operand.vmem [shape: f32[1,128], index: 5, kind: input, shape index: {}]   ;;  %s618_s6 = inlined_call_operand.hbm [shape: f32[8,128], index: 6, kind: output, shape index: {}]  }
   0x1   :  { %12 = vsyncpa [#allocation6], 0  ;;  %s33_s23 = sshll.u32 %s614_s2, 4  ;;  %s34_s23 = int_to_ptr.hbm [resolvable:$true] %s33_s23 }
   0x2   :  { %13 = vsyncpa [#allocation4], 0  ;;  %s546_s24 = smov [#allocation5]   ;;  %s20_s28 = sshll.u32 %s613_s1, 4  ;;  %s21_s28 = int_to_ptr.hbm [resolvable:$true] %s20_s28 }
   0x3   :  { %s35_s25 = sshll.u32 %s546_s24, 4  ;;  %s547_s29 = smov 64   ;;  %s36_s25 = int_to_ptr.vmem [resolvable:$true] %s35_s25 }
   0x4   :  { %s548_s30 = smov 4   ;;  %s549_s7 = smov [#allocation2]  }
   0x5   :  { %41 = dma.hbm_to_vmem [thread:$0]  %s34_s23, 1024, %s36_s25, [#allocation6], %s547_s29, %s547_s29, %s548_s30  }
   0x6   :  { %s22_s8 = sshll.u32 %s549_s7, 4  ;;  %s550_s9 = smov 128   ;;  %s23_s8 = int_to_ptr.vmem [resolvable:$true] %s22_s8 }
   0x7   :  { %s551_s10 = smov 8   ;;  %s48_s12 = sshll.u32 %s616_s4, 4  ;;  %s49_s12 = int_to_ptr.hbm [resolvable:$true] %s48_s12 }
   0x8   :  { %28 = dma.hbm_to_vmem [thread:$0]  %s21_s28, 896, %s23_s8, [#allocation3], %s550_s9, %s550_s9, %s551_s10  }
   0x9   :  { %s552_s13 = smov [#allocation7]  }
   0xa   :  { %s50_s14 = sshll.u32 %s552_s13, 4  ;;  %s51_s14 = int_to_ptr.vmem [resolvable:$true] %s50_s14 }
   0xb   :  { %56 = dma.hbm_to_vmem [thread:$0]  %s49_s12, 1024, %s51_s14, [#allocation6], %s547_s29, %s547_s29, %s548_s30  }
   0xc   :  { %540 = dma.done.wait [#allocation3], 896  }
   0xd   :  { %541 = vsyncadd [#allocation3], 4294966400 }
   0xe   :  { %542 = dma.done.wait [#allocation6], 2048  }
   0xf   :  { %543 = vsyncadd [#allocation6], 4294965248  ;;  %v553_v0 = vmov 0   ;;  %vm91_vm0 = vcmask 1041408   ;;  %v73_v1 = vld [vmem:[%s612_s0] sm:$0xff]  ;;  %v85_v3 = vld [vmem:[#allocation2 + $0x28] sm:$0xff]  ;;  %v71_v15 = vlaneseq }
  0x10   :  { %433 = vset.pattern.permute.xlu0 %v553_v0  ;;  %v86_v2 = vld [vmem:[#allocation2 + $0x30] sm:$0x3]  ;;  %v84_v4 = vld [vmem:[#allocation2 + $0x20] sm:$0xff]  ;;  %v83_v5 = vld [vmem:[#allocation2 + $0x18] sm:$0xff]  ;;  %vm87_vm1 = vcmask 408576   ;;  %v554_v19 = vmov 0.0  }
  0x11   :  { %75 = vperm.xlu0 %433, %v73_v1   ;;  %339 = vmatpush.msk.msra.mxu0 %vm91_vm0, %v86_v2  ;;  %v82_v6 = vld [vmem:[#allocation2 + $0x10] sm:$0xff]  ;;  %v81_v7 = vld [vmem:[#allocation2 + $0x8] sm:$0xff]  ;;  %v80_v8 = vld [vmem:[#allocation2] sm:$0xff]  ;;  %v72_v17 = vand.u32 127, %v71_v15  ;;  %s327_s20 = sshll.u32 %s618_s6, 4  ;;  %s328_s20 = int_to_ptr.hbm [resolvable:$true] %s327_s20 }
  0x12   :  { %v414_v9 = vld [vmem:[#allocation5 + $0x38] sm:$0xff]  ;;  %v413_v10 = vld [vmem:[#allocation5 + $0x30] sm:$0xff]  ;;  %v412_v11 = vld [vmem:[#allocation5 + $0x28] sm:$0xff] }
  0x13   :  { %105 = vmatpush.msra.mxu0 %v85_v3  ;;  %184 = vmatpush.bf16.msra.mxu1 %v414_v9  ;;  %v411_v12 = vld [vmem:[#allocation5 + $0x20] sm:$0xff]  ;;  %v410_v13 = vld [vmem:[#allocation5 + $0x18] sm:$0xff]  ;;  %v409_v14 = vld [vmem:[#allocation5 + $0x10] sm:$0xff] }
  0x14   :  { %v408_v16 = vld [vmem:[#allocation5 + $0x8] sm:$0xff]  ;;  %v407_v21 = vld [vmem:[#allocation5] sm:$0xff]  ;;  %v422_v24 = vld [vmem:[#allocation7 + $0x38] sm:$0xff] }
  0x15   :  { %106 = vmatpush.msra.mxu0 %v84_v4  ;;  %286 = vmatpush.bf16.msra.mxu2 %v422_v24  ;;  %v421_v25 = vld [vmem:[#allocation7 + $0x30] sm:$0xff]  ;;  %v420_v26 = vld [vmem:[#allocation7 + $0x28] sm:$0xff]  ;;  %v419_v27 = vld [vmem:[#allocation7 + $0x20] sm:$0xff] }
  0x16   :  { %v418_v28 = vld [vmem:[#allocation7 + $0x18] sm:$0xff]  ;;  %v417_v29 = vld [vmem:[#allocation7 + $0x10] sm:$0xff]  ;;  %v416_v30 = vld [vmem:[#allocation7 + $0x8] sm:$0xff] }
  0x17   :  { %107 = vmatpush.msra.mxu0 %v83_v5  ;;  %185 = vmatpush.bf16.msra.mxu1 %v413_v10  ;;  %v415_v31 = vld [vmem:[#allocation7] sm:$0xff]  ;;  %v434_v32 = vld [vmem:[%s615_s3] ss:$0 sm:$0xff] }
  0x18   :  { %v435_v51 = vld [vmem:[%s617_s5] ss:$0 sm:$0xff]  ;;  %s555_s5 = smov [#allocation8]  }
  0x19   :  { %108 = vmatpush.msra.mxu0 %v82_v6  ;;  %287 = vmatpush.bf16.msra.mxu2 %v421_v25  ;;  %s325_s17 = sshll.u32 %s555_s5, 4  ;;  %s326_s17 = int_to_ptr.vmem [resolvable:$true] %s325_s17 }
  0x1b   :  { %109 = vmatpush.msra.mxu0 %v81_v7  ;;  %186 = vmatpush.bf16.msra.mxu1 %v412_v11 }
  0x1d   :  { %110 = vmatpush.msra.mxu0 %v80_v8  ;;  %288 = vmatpush.bf16.msra.mxu2 %v420_v26 }
  0x1f   :  { %187 = vmatpush.bf16.msra.mxu1 %v411_v12 }
  0x21   :  { %289 = vmatpush.bf16.msra.mxu2 %v419_v27 }
  0x23   :  { %188 = vmatpush.bf16.msra.mxu1 %v410_v13 }
  0x25   :  { %290 = vmatpush.bf16.msra.mxu2 %v418_v28 }
  0x27   :  { %189 = vmatpush.bf16.msra.mxu1 %v409_v14 }
  0x29   :  { %291 = vmatpush.bf16.msra.mxu2 %v417_v29 }
  0x2b   :  { %190 = vmatpush.bf16.msra.mxu1 %v408_v16 }
  0x2d   :  { %292 = vmatpush.bf16.msra.mxu2 %v416_v30 }
  0x2f   :  { %191 = vmatpush.bf16.msra.mxu1 %v407_v21 }
  0x31   :  { %293 = vmatpush.bf16.msra.mxu2 %v415_v31 }
  0x83   :  { %v76_v18 = vpop.permute.xlu0 %75 }
  0x84   :  { %vm77_vm2 = vcmp.eq.s32.totalorder %v72_v17, %v76_v18 }
  0x85   :  { %v338_v20 = vsel %vm77_vm2, 1.0, %v554_v19 }
  0x86   :  { %340 = vmatmul.msk.f32.vlgmr.msra.gmra.mxu0 %vm87_vm1, %v338_v20 }
 0x103   :  { %v112_v22 = vpop.f32.mrf.mxu0 }
 0x104   :  { %v115_v23 = vpack.c.bf16 %v112_v22, %v112_v22 }
 0x106   :  { %192 = vmatmul.bf16.vlgmr.msra.gmra.mxu1 %v115_v23 }
 0x183   :  { %v193_v33 = vpop.f32.mrf.mxu1 }
 0x184   :  { %v194_v34 = vadd.f32 %v434_v32, %v193_v33 }
 0x186   :  { %v373_v35 = vmul.f32 -1.442695, %v194_v34 }
 0x188   :  { %436 = vpow2.f32 %v373_v35 }
 0x18b   :  { %v195_v36 = vpop.f32.mrf.mxu1 }
 0x18e   :  { %v437_v37 = vpop.eup %436 }
 0x18f   :  { %v200_v38 = vadd.f32 1.0, %v437_v37 }
 0x191   :  { %438 = vrcp.f32 %v200_v38  ;;  %v212_v42 = vand.u32 2147483648, %v200_v38  ;;  %v210_v44 = vand.u32 2147483647, %v200_v38  ;;  %vm206_vm4 = vweird.f32 %v200_v38 }
 0x193   :  { %v213_v46 = vor.u32 1.1754944e-38, %v212_v42  ;;  %vm211_vm6 = vcmp.eq.f32.partialorder %v210_v44, 8.507059e+37 }
 0x197   :  { %v439_v39 = vpop.eup %438 }
 0x198   :  { %v202_v40 = vmul.f32 %v439_v39, %v200_v38  ;;  %vm207_vm3 = vweird.f32 %v439_v39 }
 0x199   :  { %vm208_vm5 = vmor %vm206_vm4, %vm207_vm3 }
 0x19a   :  { %v203_v41 = vsub.f32 1.0, %v202_v40 }
 0x19c   :  { %v204_v43 = vmul.f32 %v439_v39, %v203_v41 }
 0x19e   :  { %v205_v45 = vadd.f32 %v439_v39, %v204_v43 }
 0x1a0   :  { %v209_v47 = vsel %vm208_vm5, %v439_v39, %v205_v45 }
 0x1a1   :  { %v214_v48 = vsel %vm211_vm6, %v213_v46, %v209_v47 }
 0x1a2   :  { %v216_v49 = vmul.f32 %v214_v48, %v194_v34 }
 0x1a4   :  { %v217_v50 = vpack.c.bf16 %v216_v49, %v216_v49 }
 0x1a6   :  { %294 = vmatmul.bf16.vlgmr.msra.gmra.mxu2 %v217_v50 }
 0x229   :  { %v295_v52 = vpop.f32.mrf.mxu2 }
 0x22a   :  { %v296_v53 = vadd.f32 %v435_v51, %v295_v52 }
 0x22c   :  { %v406_v54 = vmul.f32 -1.442695, %v296_v53 }
 0x22e   :  { %440 = vpow2.f32 %v406_v54 }
 0x231   :  { %v297_v55 = vpop.f32.mrf.mxu2 }
 0x234   :  { %v441_v56 = vpop.eup %440 }
 0x235   :  { %v302_v57 = vadd.f32 1.0, %v441_v56 }
 0x237   :  { %442 = vrcp.f32 %v302_v57  ;;  %v314_v61 = vand.u32 2147483648, %v302_v57  ;;  %v312_v63 = vand.u32 2147483647, %v302_v57  ;;  %vm308_vm8 = vweird.f32 %v302_v57 }
 0x239   :  { %v315_v1 = vor.u32 1.1754944e-38, %v314_v61  ;;  %vm313_vm10 = vcmp.eq.f32.partialorder %v312_v63, 8.507059e+37 }
 0x23d   :  { %v443_v58 = vpop.eup %442 }
 0x23e   :  { %v304_v59 = vmul.f32 %v443_v58, %v302_v57  ;;  %vm309_vm7 = vweird.f32 %v443_v58 }
 0x23f   :  { %vm310_vm9 = vmor %vm308_vm8, %vm309_vm7 }
 0x240   :  { %v305_v60 = vsub.f32 1.0, %v304_v59 }
 0x242   :  { %v306_v62 = vmul.f32 %v443_v58, %v305_v60 }
 0x244   :  { %v307_v0 = vadd.f32 %v443_v58, %v306_v62 }
 0x246   :  { %v311_v2 = vsel %vm310_vm9, %v443_v58, %v307_v0 }
 0x247   :  { %v316_v3 = vsel %vm313_vm10, %v315_v1, %v311_v2 }
 0x248   :  { %v318_v4 = vmul.f32 %v316_v3, %v296_v53 }
 0x24a   :  { %319 = vst [vmem:[#allocation8] sm:$0xff] %v318_v4 }
 0x24b   :  { %330 = dma.vmem_to_hbm [thread:$0]  %s326_s17, 128, %s328_s20, [#allocation4]  }
 0x24c   :  { %544 = dma.done.wait [#allocation4], 128  }
 0x24d   :  { %545 = vsyncadd [#allocation4], 4294967168 }
 0x24e   :  { %335 = vsyncpa [#allocation3], 1 }
 0x24f   :  { %336 = vsyncpa [#allocation6], 1 }
 0x250   :  { %337 = vsyncpa [#allocation4], 1 }

</bundles_post_ra>
